<compile_context>
chip_gen: v5e
topology: v5e:2x2
jax: 0.10.0
libtpu: 0.0.40
codegen_flags: <defaults>
</compile_context>

<pallas_src>
import functools

import jax
import jax.numpy as jnp
from jax.experimental import pallas as pl
from jax.experimental.pallas import tpu as pltpu

LEAKY_SLOPE = 0.1
BN_EPS = 1e-5

_CH = 8            # channel granularity (sublane-friendly, avoids 128x padding)
_TILE_M = 256      # row tile for the plain conv (512 rows -> 2 parallel steps)
_TILE_M_BN = 64    # row tile for the fused conv+BN (128 rows -> 2 pipelined steps)
_VMEM_LIMIT = 8 * 1024 * 1024   # live buffers per step are only a few 100 KiB


def _round_up(x, m):
    return ((x + m - 1) // m) * m


def _tile_rows(m, tile):
    """Pick the M tile size (multiple of 16 for bf16 tiles) and padded extent."""
    tm = min(tile, _round_up(m, 16))
    return tm, _round_up(m, tm)


def _params(parallel):
    return pltpu.CompilerParams(
        dimension_semantics=(("parallel",) if parallel else ("arbitrary",)),
        vmem_limit_bytes=_VMEM_LIMIT,
    )


# ------------------------------ Pallas kernels -------------------------------

def _conv_lrelu_kernel(p_ref, w_ref, o_ref):
    """(TM, K) bf16 @ (K, C) bf16 -> f32 accumulate, LeakyReLU(0.1), store bf16."""
    y = jnp.dot(p_ref[...], w_ref[...], preferred_element_type=jnp.float32)
    o_ref[...] = jnp.maximum(y, LEAKY_SLOPE * y).astype(o_ref.dtype)


def _conv_bn_lrelu_kernel(p_ref, w_ref, g_ref, b_ref, o_ref, y_scr, *, tm, m_valid):
    """Fused conv matmul + single-pass train-mode BatchNorm + LeakyReLU.

    Grid tiles M sequentially ("arbitrary").  Each step writes its raw f32 conv
    tile into the persistent VMEM scratch `y_scr`; the last step computes the
    batch mean/variance from the resident data (exact mean-subtracted pass,
    biased variance, matching torch train-mode BN), folds in gamma/beta and
    writes the bf16 activation into the VMEM-resident output block.
    """
    i = pl.program_id(0)
    y = jnp.dot(p_ref[...], w_ref[...], preferred_element_type=jnp.float32)
    y_scr[pl.ds(pl.multiple_of(i * tm, tm), tm), :] = y

    @pl.when(i == pl.num_programs(0) - 1)
    def _():
        y_all = y_scr[...]                                     # (m_pad, C) f32
        inv_m = 1.0 / float(m_valid)
        # Padded rows are exact zeros (zero patches), so summing all rows and
        # dividing by the true row count is exact.
        mean = jnp.sum(y_all, axis=0, keepdims=True) * inv_m
        row = jax.lax.broadcasted_iota(jnp.int32, y_all.shape, 0)
        d = jnp.where(row < m_valid, y_all - mean, 0.0)        # masked (y - mean)
        var = jnp.sum(d * d, axis=0, keepdims=True) * inv_m    # biased variance
        inv = g_ref[...] * jax.lax.rsqrt(var + BN_EPS)
        z = d * inv + b_ref[...]
        o_ref[...] = jnp.maximum(z, LEAKY_SLOPE * z).astype(o_ref.dtype)


def _linear_kernel(x_ref, w_ref, b_ref, o_ref):
    """(N, F) bf16 @ (F, Z) bf16 + bias -> f32."""
    o_ref[...] = (
        jnp.dot(x_ref[...], w_ref[...], preferred_element_type=jnp.float32)
        + b_ref[...]
    )


# --------------------------------- JAX glue ----------------------------------

def _im2col(x_nhwc, ksize, stride, pad):
    """(N,H,W,C) bf16 -> (N*Ho*Wo, k*k*C) bf16 patches, (kh, kw, c) order.

    No K padding to 128 and no dtype cast (activations are already bf16);
    XLA fuses the pad/slice/concat/reshape chain into a couple of fusions.
    """
    n, h, w, c = x_nhwc.shape
    xp = jnp.pad(x_nhwc, ((0, 0), (pad, pad), (pad, pad), (0, 0)))
    ho = (h + 2 * pad - ksize) // stride + 1
    wo = (w + 2 * pad - ksize) // stride + 1
    cols = []
    for i in range(ksize):
        for j in range(ksize):
            cols.append(xp[:, i:i + stride * ho:stride, j:j + stride * wo:stride, :])
    patches = jnp.concatenate(cols, axis=-1).reshape(n * ho * wo, ksize * ksize * c)
    return patches, ho, wo


def _prep_conv_weight(w_oihw, cin_pad):
    """torch (Cout,Cin,KH,KW) -> (KH*KW*cin_pad, cout_pad) bf16 im2col weight.

    cin is padded to the *previous layer's* emitted channel count with zero
    rows (phantom input channels contribute nothing); cout is padded to a
    multiple of 8 only, keeping stores small.
    """
    cout, cin, kh, kw = w_oihw.shape
    cout_pad = _round_up(cout, _CH)
    wf = jnp.transpose(w_oihw, (2, 3, 1, 0))                   # (KH, KW, Cin, Cout)
    wf = jnp.pad(wf, ((0, 0), (0, 0), (0, cin_pad - cin), (0, cout_pad - cout)))
    return wf.reshape(kh * kw * cin_pad, cout_pad).astype(jnp.bfloat16), cout_pad


def _prep_linear_weight(w, c_true, c_pad, h, wsp, z_pad):
    """torch Linear weight (z, C*H*W) over an NCHW flatten -> (H*W*c_pad, z_pad) bf16.

    Rows are reordered to the NHWC flatten order our activations use and zero
    rows are inserted for phantom channels, so the forward needs no activation
    transpose / channel slice before the matmul (matches NetE's
    `out.view(-1, nef*8*8)` + Linear on NCHW; intentional, documented).
    """
    z, f = w.shape
    assert f == c_true * h * wsp
    w4 = w.reshape(z, c_true, h, wsp)
    w4 = jnp.pad(w4, ((0, z_pad - z), (0, c_pad - c_true), (0, 0), (0, 0)))
    wt = jnp.transpose(w4, (2, 3, 1, 0)).reshape(h * wsp * c_pad, z_pad)
    return wt.astype(jnp.bfloat16)


# --------------------------------- layers ------------------------------------

def _conv_lrelu(x, p):
    n = x.shape[0]
    patches, ho, wo = _im2col(x, p["k"], p["s"], p["p"])
    m, kdim = patches.shape
    tm, m_pad = _tile_rows(m, _TILE_M)
    if m_pad > m:
        patches = jnp.pad(patches, ((0, m_pad - m), (0, 0)))
    cp = p["w"].shape[1]
    y = pl.pallas_call(
        _conv_lrelu_kernel,
        out_shape=jax.ShapeDtypeStruct((m_pad, cp), jnp.bfloat16),
        grid=(m_pad // tm,),
        in_specs=[pl.BlockSpec((tm, kdim), lambda i: (i, 0)),   # patch row tiles
                  pl.BlockSpec((kdim, cp), lambda i: (0, 0))],  # resident weight
        out_specs=pl.BlockSpec((tm, cp), lambda i: (i, 0)),
        compiler_params=_params(parallel=True),
    )(patches, p["w"])
    if m_pad > m:
        y = y[:m]
    return y.reshape(n, ho, wo, cp)


def _conv_bn_lrelu(x, p):
    n = x.shape[0]
    patches, ho, wo = _im2col(x, p["k"], p["s"], p["p"])
    m, kdim = patches.shape
    tm, m_pad = _tile_rows(m, _TILE_M_BN)
    if m_pad > m:
        patches = jnp.pad(patches, ((0, m_pad - m), (0, 0)))
    cp = p["w"].shape[1]
    t = m_pad // tm
    kern = functools.partial(_conv_bn_lrelu_kernel, tm=tm, m_valid=m)
    # The whole output (and a same-sized f32 scratch) stays resident in VMEM
    # across the sequential grid; fine at these sizes (a few KiB .. few MiB).
    y = pl.pallas_call(
        kern,
        out_shape=jax.ShapeDtypeStruct((m_pad, cp), jnp.bfloat16),
        grid=(t,),
        in_specs=[pl.BlockSpec((tm, kdim), lambda i: (i, 0)),
                  pl.BlockSpec((kdim, cp), lambda i: (0, 0)),
                  pl.BlockSpec((1, cp), lambda i: (0, 0)),      # gamma
                  pl.BlockSpec((1, cp), lambda i: (0, 0))],     # beta
        out_specs=pl.BlockSpec((m_pad, cp), lambda i: (0, 0)),  # VMEM-resident
        scratch_shapes=[pltpu.VMEM((m_pad, cp), jnp.float32)],
        compiler_params=_params(parallel=False),                # sequential grid
    )(patches, p["w"], p["gamma"], p["beta"])
    if m_pad > m:
        y = y[:m]
    return y.reshape(n, ho, wo, cp)


def _linear(x, p):
    n = x.shape[0]
    f = x.shape[1] * x.shape[2] * x.shape[3]
    x2 = x.reshape(n, f)                     # NHWC flatten, bf16 (free reshape)
    w, b = p["w"], p["b"]
    fz, zp = w.shape
    assert fz == f
    # M = batch (2) and one z block: nothing useful to split, keep grid=(1,).
    out = pl.pallas_call(
        _linear_kernel,
        out_shape=jax.ShapeDtypeStruct((n, zp), jnp.float32),
        grid=(1,),
        in_specs=[pl.BlockSpec((n, fz), lambda i: (0, 0)),
                  pl.BlockSpec((fz, zp), lambda i: (0, 0)),
                  pl.BlockSpec((1, zp), lambda i: (0, 0))],
        out_specs=pl.BlockSpec((n, zp), lambda i: (0, 0)),
        compiler_params=_params(parallel=True),
    )(x2, w, b)
    if zp != p["z_dim"]:
        out = out[:, :p["z_dim"]]
    return out


# ------------------------------ params / forward -----------------------------

def init_encoder_params(key, input_size, z_dim, channel, nef, n_extra_layer=0):
    assert input_size % 16 == 0, "input size has to be a multiple of 16"
    cnef, tisize = nef, 8
    while tisize != input_size:
        cnef = cnef // 2
        tisize = tisize * 2

    keys = jax.random.split(key, 64)
    ki = 0
    params = []
    cin_pad = _round_up(channel, _CH)

    # initial Conv(channel -> cnef, k3 s1 p1, no bias) + LeakyReLU(0.1)
    w = 0.05 * jax.random.normal(keys[ki], (cnef, channel, 3, 3), jnp.float32)
    ki += 1
    wflat, prev_pad = _prep_conv_weight(w, cin_pad)
    params.append(("conv_lrelu", {"w": wflat, "k": 3, "s": 1, "p": 1}))

    csize = input_size
    while csize > 8:
        # pyramid Conv(cnef -> 2*cnef, k4 s2 p1, no bias) + BN + LeakyReLU
        co = cnef * 2
        w = 0.05 * jax.random.normal(keys[ki], (co, cnef, 4, 4), jnp.float32)
        ki += 1
        wflat, cout_pad = _prep_conv_weight(w, prev_pad)
        params.append(("conv_bn_lrelu", {
            "w": wflat,
            "gamma": jnp.pad(jnp.ones((co,), jnp.float32),
                             (0, cout_pad - co)).reshape(1, cout_pad),
            "beta": jnp.zeros((1, cout_pad), jnp.float32),
            "k": 4, "s": 2, "p": 1}))
        prev_pad = cout_pad
        csize //= 2
        cnef *= 2

    for _ in range(n_extra_layer):
        w = 0.05 * jax.random.normal(keys[ki], (cnef, cnef, 3, 3), jnp.float32)
        ki += 1
        wflat, cout_pad = _prep_conv_weight(w, prev_pad)
        params.append(("conv_bn_lrelu", {
            "w": wflat,
            "gamma": jnp.pad(jnp.ones((cnef,), jnp.float32),
                             (0, cout_pad - cnef)).reshape(1, cout_pad),
            "beta": jnp.zeros((1, cout_pad), jnp.float32),
            "k": 3, "s": 1, "p": 1}))
        prev_pad = cout_pad

    # last Linear(cnef*8*8 -> z_dim); weight rows pre-reordered to NHWC order.
    zp = _round_up(z_dim, _CH)
    wl = 0.05 * jax.random.normal(keys[ki], (z_dim, cnef * 8 * 8), jnp.float32)
    ki += 1
    bl = 0.01 * jax.random.normal(keys[ki], (z_dim,), jnp.float32)
    ki += 1
    params.append(("linear", {
        "w": _prep_linear_weight(wl, cnef, prev_pad, 8, 8, zp),
        "b": jnp.pad(bl, (0, zp - z_dim)).reshape(1, zp),
        "z_dim": z_dim}))
    return params


def encoder_forward(params, x_nchw):
    """x_nchw: (N, C, H, W) float32 (PyTorch layout). Returns (N, z_dim) f32."""
    c = x_nchw.shape[1]
    cin_pad = _round_up(c, _CH)
    x = jnp.transpose(x_nchw, (0, 2, 3, 1))                    # NCHW -> NHWC
    if cin_pad > c:
        x = jnp.pad(x, ((0, 0), (0, 0), (0, 0), (0, cin_pad - c)))
    x = x.astype(jnp.bfloat16)   # bf16 activations between layers (MXU-native)
    for kind, p in params:
        if kind == "conv_lrelu":
            x = _conv_lrelu(x, p)
        elif kind == "conv_bn_lrelu":
            x = _conv_bn_lrelu(x, p)
        else:  # linear
            x = _linear(x, p)
    return x


# ----------------------------------- main ------------------------------------

if __name__ == "__main__":
    input_size, z_dim, channel, nef = 16, 32, 4, 8
    batch = 2

    key = jax.random.PRNGKey(0)
    k_param, k_x = jax.random.split(key)
    params = init_encoder_params(k_param, input_size, z_dim, channel, nef,
                                 n_extra_layer=0)
    x = jax.random.normal(k_x, (batch, channel, input_size, input_size),
                          jnp.float32)

    fwd = jax.jit(lambda inp: encoder_forward(params, inp))
    out = jax.block_until_ready(fwd(x))

    assert out.shape == (batch, z_dim), out.shape
    assert out.dtype == jnp.float32
    assert bool(jnp.all(jnp.isfinite(out)))
    print("KERNEL_OK")
</pallas_src>

<mosaic_0001>
module attributes {stable_mosaic.version = 11 : i64} {
  func.func @_conv_lrelu_kernel(%arg0: i32, %arg1: memref<256x72xbf16, #tpu.memory_space<vmem>>, %arg2: memref<72x8xbf16, #tpu.memory_space<vmem>>, %arg3: memref<256x8xbf16, #tpu.memory_space<vmem>>) attributes {dimension_semantics = [#tpu.dimension_semantics<parallel>], iteration_bounds = array<i64: 2>, scalar_prefetch = 0 : i64, scratch_operands = 0 : i64, tpu.core_type = #tpu.core_type<tc>, window_params = [{transform_indices = @transform_0, window_bounds = array<i64: 256, 72>}, {pipeline_mode = #tpu.pipeline_mode<synchronous>, transform_indices = @transform_1, window_bounds = array<i64: 72, 8>}, {transform_indices = @transform_2, window_bounds = array<i64: 256, 8>}]} {
    %c0 = arith.constant 0 : index
    %c0_0 = arith.constant 0 : index
    %0 = vector.load %arg1[%c0, %c0_0] : memref<256x72xbf16, #tpu.memory_space<vmem>>, vector<256x72xbf16>
    %c0_1 = arith.constant 0 : index
    %c0_2 = arith.constant 0 : index
    %1 = vector.load %arg2[%c0_1, %c0_2] : memref<72x8xbf16, #tpu.memory_space<vmem>>, vector<72x8xbf16>
    %cst = arith.constant dense<0.000000e+00> : vector<256x8xf32>
    %2 = tpu.matmul %0, %1, %cst {dimension_numbers = #tpu.dot_dimension_numbers<[1], [0], [0], [1], [0, 0, 1, 1], [], []>} : vector<256x72xbf16>, vector<72x8xbf16>, vector<256x8xf32> -> vector<256x8xf32>
    %cst_3 = arith.constant 1.000000e-01 : f32
    %3 = vector.broadcast %cst_3 : f32 to vector<256x8xf32>
    %4 = arith.mulf %3, %2 : vector<256x8xf32>
    %5 = arith.maximumf %2, %4 : vector<256x8xf32>
    %6 = arith.truncf %5 : vector<256x8xf32> to vector<256x8xbf16>
    %c0_4 = arith.constant 0 : index
    %c0_5 = arith.constant 0 : index
    %7 = vector.load %arg3[%c0_4, %c0_5] : memref<256x8xbf16, #tpu.memory_space<vmem>>, vector<256x8xbf16>
    tpu.vector_store %arg3[%c0_4, %c0_5], %6 {strides = array<i32>} : memref<256x8xbf16, #tpu.memory_space<vmem>>, vector<256x8xbf16>,
    return
  }
  func.func @transform_0(%arg0: i32) -> (i32, i32) {
    %c0_i32 = arith.constant 0 : i32
    %c0_i32_0 = arith.constant 0 : i32
    return %arg0, %c0_i32 : i32, i32
  }
  func.func @transform_1(%arg0: i32) -> (i32, i32) {
    %c0_i32 = arith.constant 0 : i32
    %c0_i32_0 = arith.constant 0 : i32
    %c0_i32_1 = arith.constant 0 : i32
    return %c0_i32, %c0_i32_0 : i32, i32
  }
  func.func @transform_2(%arg0: i32) -> (i32, i32) {
    %c0_i32 = arith.constant 0 : i32
    %c0_i32_0 = arith.constant 0 : i32
    return %arg0, %c0_i32 : i32, i32
  }
}

module attributes {stable_mosaic.version = 11 : i64} {
  func.func @_linear_kernel(%arg0: i32, %arg1: memref<2x512xbf16, #tpu.memory_space<vmem>>, %arg2: memref<512x32xbf16, #tpu.memory_space<vmem>>, %arg3: memref<1x32xf32, #tpu.memory_space<vmem>>, %arg4: memref<2x32xf32, #tpu.memory_space<vmem>>) attributes {dimension_semantics = [#tpu.dimension_semantics<parallel>], iteration_bounds = array<i64: 1>, scalar_prefetch = 0 : i64, scratch_operands = 0 : i64, tpu.core_type = #tpu.core_type<tc>, window_params = [{pipeline_mode = #tpu.pipeline_mode<synchronous>, transform_indices = @transform_0, window_bounds = array<i64: 2, 512>}, {pipeline_mode = #tpu.pipeline_mode<synchronous>, transform_indices = @transform_1, window_bounds = array<i64: 512, 32>}, {pipeline_mode = #tpu.pipeline_mode<synchronous>, transform_indices = @transform_2, window_bounds = array<i64: 1, 32>}, {pipeline_mode = #tpu.pipeline_mode<synchronous>, transform_indices = @transform_3, window_bounds = array<i64: 2, 32>}]} {
    %c0 = arith.constant 0 : index
    %c0_0 = arith.constant 0 : index
    %0 = vector.load %arg1[%c0, %c0_0] : memref<2x512xbf16, #tpu.memory_space<vmem>>, vector<2x512xbf16>
    %c0_1 = arith.constant 0 : index
    %c0_2 = arith.constant 0 : index
    %1 = vector.load %arg2[%c0_1, %c0_2] : memref<512x32xbf16, #tpu.memory_space<vmem>>, vector<512x32xbf16>
    %cst = arith.constant dense<0.000000e+00> : vector<2x32xf32>
    %2 = tpu.matmul %0, %1, %cst {dimension_numbers = #tpu.dot_dimension_numbers<[1], [0], [0], [1], [0, 0, 1, 1], [], []>} : vector<2x512xbf16>, vector<512x32xbf16>, vector<2x32xf32> -> vector<2x32xf32>
    %c0_3 = arith.constant 0 : index
    %c0_4 = arith.constant 0 : index
    %3 = vector.load %arg3[%c0_3, %c0_4] : memref<1x32xf32, #tpu.memory_space<vmem>>, vector<1x32xf32>
    %4 = vector.broadcast %3 : vector<1x32xf32> to vector<2x32xf32>
    %5 = arith.addf %2, %4 : vector<2x32xf32>
    %c0_5 = arith.constant 0 : index
    %c0_6 = arith.constant 0 : index
    %6 = vector.load %arg4[%c0_5, %c0_6] : memref<2x32xf32, #tpu.memory_space<vmem>>, vector<2x32xf32>
    tpu.vector_store %arg4[%c0_5, %c0_6], %5 {strides = array<i32>} : memref<2x32xf32, #tpu.memory_space<vmem>>, vector<2x32xf32>,
    return
  }
  func.func @transform_0(%arg0: i32) -> (i32, i32) {
    %c0_i32 = arith.constant 0 : i32
    %c0_i32_0 = arith.constant 0 : i32
    %c0_i32_1 = arith.constant 0 : i32
    return %c0_i32, %c0_i32_0 : i32, i32
  }
  func.func @transform_1(%arg0: i32) -> (i32, i32) {
    %c0_i32 = arith.constant 0 : i32
    %c0_i32_0 = arith.constant 0 : i32
    %c0_i32_1 = arith.constant 0 : i32
    return %c0_i32, %c0_i32_0 : i32, i32
  }
  func.func @transform_2(%arg0: i32) -> (i32, i32) {
    %c0_i32 = arith.constant 0 : i32
    %c0_i32_0 = arith.constant 0 : i32
    %c0_i32_1 = arith.constant 0 : i32
    return %c0_i32, %c0_i32_0 : i32, i32
  }
  func.func @transform_3(%arg0: i32) -> (i32, i32) {
    %c0_i32 = arith.constant 0 : i32
    %c0_i32_0 = arith.constant 0 : i32
    %c0_i32_1 = arith.constant 0 : i32
    return %c0_i32, %c0_i32_0 : i32, i32
  }
}

module attributes {stable_mosaic.version = 11 : i64} {
  func.func @_conv_bn_lrelu_kernel(%arg0: i32, %arg1: memref<64x128xbf16, #tpu.memory_space<vmem>>, %arg2: memref<128x8xbf16, #tpu.memory_space<vmem>>, %arg3: memref<1x8xf32, #tpu.memory_space<vmem>>, %arg4: memref<1x8xf32, #tpu.memory_space<vmem>>, %arg5: memref<128x8xbf16, #tpu.memory_space<vmem>>, %arg6: memref<128x8xf32, #tpu.memory_space<vmem>>) attributes {dimension_semantics = [#tpu.dimension_semantics<arbitrary>], iteration_bounds = array<i64: 2>, scalar_prefetch = 0 : i64, scratch_operands = 1 : i64, tpu.core_type = #tpu.core_type<tc>, window_params = [{transform_indices = @transform_0, window_bounds = array<i64: 64, 128>}, {pipeline_mode = #tpu.pipeline_mode<synchronous>, transform_indices = @transform_1, window_bounds = array<i64: 128, 8>}, {pipeline_mode = #tpu.pipeline_mode<synchronous>, transform_indices = @transform_2, window_bounds = array<i64: 1, 8>}, {pipeline_mode = #tpu.pipeline_mode<synchronous>, transform_indices = @transform_3, window_bounds = array<i64: 1, 8>}, {pipeline_mode = #tpu.pipeline_mode<synchronous>, transform_indices = @transform_4, window_bounds = array<i64: 128, 8>}]} {
    %c0 = arith.constant 0 : index
    %c0_0 = arith.constant 0 : index
    %0 = vector.load %arg1[%c0, %c0_0] : memref<64x128xbf16, #tpu.memory_space<vmem>>, vector<64x128xbf16>
    %c0_1 = arith.constant 0 : index
    %c0_2 = arith.constant 0 : index
    %1 = vector.load %arg2[%c0_1, %c0_2] : memref<128x8xbf16, #tpu.memory_space<vmem>>, vector<128x8xbf16>
    %cst = arith.constant dense<0.000000e+00> : vector<64x8xf32>
    %2 = tpu.matmul %0, %1, %cst {dimension_numbers = #tpu.dot_dimension_numbers<[1], [0], [0], [1], [0, 0, 1, 1], [], []>} : vector<64x128xbf16>, vector<128x8xbf16>, vector<64x8xf32> -> vector<64x8xf32>
    %c64_i32 = arith.constant 64 : i32
    %3 = arith.muli %arg0, %c64_i32 : i32
    %4 = tpu.assume_multiple %3, 64 : i32
    %5 = arith.index_cast %4 : i32 to index
    %c0_3 = arith.constant 0 : index
    %6 = vector.load %arg6[%5, %c0_3] : memref<128x8xf32, #tpu.memory_space<vmem>>, vector<64x8xf32>
    tpu.vector_store %arg6[%5, %c0_3], %2 {strides = array<i32>} : memref<128x8xf32, #tpu.memory_space<vmem>>, vector<64x8xf32>,
    %c1_i32 = arith.constant 1 : i32
    %7 = arith.cmpi eq, %arg0, %c1_i32 : i32
    %8 = arith.extui %7 : i1 to i32
    %c0_i32 = arith.constant 0 : i32
    %9 = arith.cmpi ne, %8, %c0_i32 : i32
    scf.if %9 {
      %c0_4 = arith.constant 0 : index
      %c0_5 = arith.constant 0 : index
      %10 = vector.load %arg6[%c0_4, %c0_5] : memref<128x8xf32, #tpu.memory_space<vmem>>, vector<128x8xf32>
      %cst_6 = arith.constant dense<0.000000e+00> : vector<8xf32>
      %11 = vector.multi_reduction <add>, %10, %cst_6 [0] : vector<128x8xf32> to vector<8xf32>
      %12 = vector.shape_cast %11 : vector<8xf32> to vector<1x8xf32>
      %cst_7 = arith.constant 7.812500e-03 : f32
      %13 = vector.broadcast %cst_7 : f32 to vector<1x8xf32>
      %14 = arith.mulf %12, %13 : vector<1x8xf32>
      %15 = tpu.iota {dimensions = array<i32: 0>} : vector<128x8xi32>
      %c128_i32 = arith.constant 128 : i32
      %16 = vector.broadcast %c128_i32 : i32 to vector<128x8xi32>
      %17 = arith.cmpi slt, %15, %16 : vector<128x8xi32>
      %18 = vector.broadcast %14 : vector<1x8xf32> to vector<128x8xf32>
      %19 = arith.subf %10, %18 : vector<128x8xf32>
      %cst_8 = arith.constant 0.000000e+00 : f32
      %20 = vector.broadcast %cst_8 : f32 to vector<128x8xf32>
      %21 = arith.select %17, %19, %20 : vector<128x8xi1>, vector<128x8xf32>
      %22 = arith.mulf %21, %21 : vector<128x8xf32>
      %cst_9 = arith.constant dense<0.000000e+00> : vector<8xf32>
      %23 = vector.multi_reduction <add>, %22, %cst_9 [0] : vector<128x8xf32> to vector<8xf32>
      %24 = vector.shape_cast %23 : vector<8xf32> to vector<1x8xf32>
      %cst_10 = arith.constant 7.812500e-03 : f32
      %25 = vector.broadcast %cst_10 : f32 to vector<1x8xf32>
      %26 = arith.mulf %24, %25 : vector<1x8xf32>
      %c0_11 = arith.constant 0 : index
      %c0_12 = arith.constant 0 : index
      %27 = vector.load %arg3[%c0_11, %c0_12] : memref<1x8xf32, #tpu.memory_space<vmem>>, vector<1x8xf32>
      %cst_13 = arith.constant 9.99999974E-6 : f32
      %28 = vector.broadcast %cst_13 : f32 to vector<1x8xf32>
      %29 = arith.addf %26, %28 : vector<1x8xf32>
      %30 = math.rsqrt %29 : vector<1x8xf32>
      %31 = arith.mulf %27, %30 : vector<1x8xf32>
      %32 = vector.broadcast %31 : vector<1x8xf32> to vector<128x8xf32>
      %33 = arith.mulf %21, %32 : vector<128x8xf32>
      %c0_14 = arith.constant 0 : index
      %c0_15 = arith.constant 0 : index
      %34 = vector.load %arg4[%c0_14, %c0_15] : memref<1x8xf32, #tpu.memory_space<vmem>>, vector<1x8xf32>
      %35 = vector.broadcast %34 : vector<1x8xf32> to vector<128x8xf32>
      %36 = arith.addf %33, %35 : vector<128x8xf32>
      %cst_16 = arith.constant 1.000000e-01 : f32
      %37 = vector.broadcast %cst_16 : f32 to vector<128x8xf32>
      %38 = arith.mulf %37, %36 : vector<128x8xf32>
      %39 = arith.maximumf %36, %38 : vector<128x8xf32>
      %40 = arith.truncf %39 : vector<128x8xf32> to vector<128x8xbf16>
      %c0_17 = arith.constant 0 : index
      %c0_18 = arith.constant 0 : index
      %41 = vector.load %arg5[%c0_17, %c0_18] : memref<128x8xbf16, #tpu.memory_space<vmem>>, vector<128x8xbf16>
      tpu.vector_store %arg5[%c0_17, %c0_18], %40 {strides = array<i32>} : memref<128x8xbf16, #tpu.memory_space<vmem>>, vector<128x8xbf16>,
    } else {
    }
    return
  }
  func.func @transform_0(%arg0: i32) -> (i32, i32) {
    %c0_i32 = arith.constant 0 : i32
    %c0_i32_0 = arith.constant 0 : i32
    return %arg0, %c0_i32 : i32, i32
  }
  func.func @transform_1(%arg0: i32) -> (i32, i32) {
    %c0_i32 = arith.constant 0 : i32
    %c0_i32_0 = arith.constant 0 : i32
    %c0_i32_1 = arith.constant 0 : i32
    return %c0_i32, %c0_i32_0 : i32, i32
  }
  func.func @transform_2(%arg0: i32) -> (i32, i32) {
    %c0_i32 = arith.constant 0 : i32
    %c0_i32_0 = arith.constant 0 : i32
    %c0_i32_1 = arith.constant 0 : i32
    return %c0_i32, %c0_i32_0 : i32, i32
  }
  func.func @transform_3(%arg0: i32) -> (i32, i32) {
    %c0_i32 = arith.constant 0 : i32
    %c0_i32_0 = arith.constant 0 : i32
    %c0_i32_1 = arith.constant 0 : i32
    return %c0_i32, %c0_i32_0 : i32, i32
  }
  func.func @transform_4(%arg0: i32) -> (i32, i32) {
    %c0_i32 = arith.constant 0 : i32
    %c0_i32_0 = arith.constant 0 : i32
    %c0_i32_1 = arith.constant 0 : i32
    return %c0_i32, %c0_i32_0 : i32, i32
  }
}

</mosaic_0001>

<bundles_post_ra>
// kernel: _lambda_.3
= control target key start
LH: loop header
LB: loop body
LE: loop exit
PB: predicated region body
PF: predicated region fallthrough
CT: control target
= control target key end

     0   :  { %s796_s9 = smov 0   ;;  %s935_s0 = inlined_call_operand.vmem [shape: bf16[512,72], index: 0, kind: input, shape index: {}]   ;;  %s936_s1 = inlined_call_operand.vmem [shape: bf16[72,8], index: 1, kind: input, shape index: {}]   ;;  %s937_s2 = inlined_call_operand.vmem [shape: bf16[512,8], index: 2, kind: output, shape index: {}]  }
   0x1 LB: > { %s623_s10 = sadd.s32 4294967295, %s779_s9   ;;  %p627_p0 = scmp.ge.s32.totalorder %s779_s9, 1  ;;  %s779_s9 = sphi %s796_s9, %s12_s9  }
   0x2   : > { %p113_p1 = scmp.lt.s32.totalorder %s779_s9, 3 }
   0x4   : > { %p114_p2 = pnand %p627_p0, %p113_p1 }
   0x5   : > { %s628_s13 = sshll.u32 (!%p114_p2), %s623_s10, 5 }
   0x6   : > { %117 = sbr.rel (%p114_p2) target bundleno = 233 (0xe9), region = 28  ;;  %p136_p3 = scmp.lt.s32.totalorder (!%p114_p2), %s628_s13, 63 }
   0xb   : > { %v188_v0 = vld [vmem:[%s936_s1 + $0x20] sm:$0xf]  ;;  %vm345_vm0 = vcmask 1043456   ;;  %v749_v4 = vld [vmem:[%s936_s1 + $0x18] sm:$0xff]  ;;  %v748_v5 = vld [vmem:[%s936_s1 + $0x10] sm:$0xff]  ;;  %s939_s13 = smov (!%p136_p3, %s628_s13), 63 }
   0xc   : > { %v286_v1 = vunpack.c.l.b16 %v188_v0  ;;  %v747_v6 = vld [vmem:[%s936_s1 + $0x8] sm:$0xff]  ;;  %s629_s20 = sshll.u32 %s939_s13, 2  ;;  %v746_v7 = vld [vmem:[%s936_s1] sm:$0xff]  ;;  %vm296_vm1 = vcmask 588800   ;;  %vm534_vm2 = vcmask 60416  }
   0xd   : > { %s827_s25 = scalar_lea.vmem %s935_s0, %s629_s20  ;;  %s866_s28 = scalar_lea.vmem %s937_s2, %s629_s20 }
   0xe   : > { %v291_v2 = vpack.c.b16 %v286_v1, %v286_v1  ;;  %v730_v8 = vld [vmem:[%s827_s25] sm:$0xff]  ;;  %v731_v12 = vld [vmem:[%s827_s25 + $0x8] sm:$0xff]  ;;  %v732_v16 = vld [vmem:[%s827_s25 + $0x10] sm:$0xff] }
   0xf   : > { %v734_v9 = vld [vmem:[%s827_s25 + $0x20] sm:$0xff]  ;;  %v735_v13 = vld [vmem:[%s827_s25 + $0x28] sm:$0xff]  ;;  %v736_v17 = vld [vmem:[%s827_s25 + $0x30] sm:$0xff] }
  0x10   : > { %v347_v3 = vsel %vm345_vm0, %v291_v2, 0  ;;  %v738_v10 = vld [vmem:[%s827_s25 + $0x40] sm:$0xff]  ;;  %v739_v14 = vld [vmem:[%s827_s25 + $0x48] sm:$0xff]  ;;  %v740_v18 = vld [vmem:[%s827_s25 + $0x50] sm:$0xff] }
  0x11   : > { %352 = vmatpush.bf16.msra.mxu0 %v347_v3  ;;  %750 = vmatpush.bf16.msra.mxu1 %v347_v3  ;;  %v742_v11 = vld [vmem:[%s827_s25 + $0x60] sm:$0xff]  ;;  %v743_v15 = vld [vmem:[%s827_s25 + $0x68] sm:$0xff]  ;;  %v744_v19 = vld [vmem:[%s827_s25 + $0x70] sm:$0xff] }
  0x12   : > { %751 = vmatpush.bf16.msra.mxu2 %v347_v3  ;;  %752 = vmatpush.bf16.msra.mxu3 %v347_v3  ;;  %v733_v20 = vld [vmem:[%s827_s25 + $0x18] sm:$0xff] }
  0x13   : > { %v737_v21 = vld [vmem:[%s827_s25 + $0x38] sm:$0xff] }
  0x14   : > { %v741_v22 = vld [vmem:[%s827_s25 + $0x58] sm:$0xff] }
  0x15   : > { %353 = vmatpush.bf16.msra.mxu0 %v749_v4  ;;  %753 = vmatpush.bf16.msra.mxu1 %v749_v4  ;;  %v745_v23 = vld [vmem:[%s827_s25 + $0x78] sm:$0xff] }
  0x16   : > { %754 = vmatpush.bf16.msra.mxu2 %v749_v4  ;;  %755 = vmatpush.bf16.msra.mxu3 %v749_v4 }
  0x19   : > { %354 = vmatpush.bf16.msra.mxu0 %v748_v5  ;;  %756 = vmatpush.bf16.msra.mxu1 %v748_v5 }
  0x1a   : > { %757 = vmatpush.bf16.msra.mxu2 %v748_v5  ;;  %758 = vmatpush.bf16.msra.mxu3 %v748_v5 }
  0x1d   : > { %355 = vmatpush.bf16.msra.mxu0 %v747_v6  ;;  %759 = vmatpush.bf16.msra.mxu1 %v747_v6 }
  0x1e   : > { %760 = vmatpush.bf16.msra.mxu2 %v747_v6  ;;  %761 = vmatpush.bf16.msra.mxu3 %v747_v6 }
  0x21   : > { %356 = vmatpush.bf16.msra.mxu0 %v746_v7  ;;  %762 = vmatpush.bf16.msra.mxu1 %v746_v7 }
  0x22   : > { %763 = vmatpush.bf16.msra.mxu2 %v746_v7  ;;  %764 = vmatpush.bf16.msra.mxu3 %v746_v7 }
  0x24   : > { %712 = vmatmul.msk.bf16.vlgmr.msra.gmra.mxu0 %vm296_vm1, %v730_v8  ;;  %716 = vmatmul.msk.bf16.vlgmr.msra.gmra.mxu1 %vm296_vm1, %v734_v9 }
  0x25   : > { %720 = vmatmul.msk.bf16.vlgmr.msra.gmra.mxu2 %vm296_vm1, %v738_v10  ;;  %724 = vmatmul.msk.bf16.vlgmr.msra.gmra.mxu3 %vm296_vm1, %v742_v11 }
  0x34   : > { %713 = vmatmul.msk.bf16.gmra.mxu0 %vm296_vm1, %v731_v12  ;;  %717 = vmatmul.msk.bf16.gmra.mxu1 %vm296_vm1, %v735_v13 }
  0x35   : > { %721 = vmatmul.msk.bf16.gmra.mxu2 %vm296_vm1, %v739_v14  ;;  %725 = vmatmul.msk.bf16.gmra.mxu3 %vm296_vm1, %v743_v15 }
  0x44   : > { %714 = vmatmul.msk.bf16.gmra.mxu0 %vm296_vm1, %v732_v16  ;;  %718 = vmatmul.msk.bf16.gmra.mxu1 %vm296_vm1, %v736_v17 }
  0x45   : > { %722 = vmatmul.msk.bf16.gmra.mxu2 %vm296_vm1, %v740_v18  ;;  %726 = vmatmul.msk.bf16.gmra.mxu3 %vm296_vm1, %v744_v19 }
  0x54   : > { %715 = vmatmul.msk.bf16.gmra.mxu0 %vm296_vm1, %v733_v20  ;;  %719 = vmatmul.msk.bf16.gmra.mxu1 %vm296_vm1, %v737_v21 }
  0x55   : > { %723 = vmatmul.msk.bf16.gmra.mxu2 %vm296_vm1, %v741_v22  ;;  %727 = vmatmul.msk.bf16.gmra.mxu3 %vm296_vm1, %v745_v23 }
  0xa1   : > { %v358_v24 = vpop.f32.mrf.mxu0  ;;  %v378_v25 = vpop.f32.mrf.mxu1 }
  0xa2   : > { %v438_v26 = vmul.f32 0.1, %v358_v24  ;;  %v446_v27 = vmul.f32 0.1, %v378_v25 }
  0xa4   : > { %v470_v28 = vmax.f32 %v358_v24, %v438_v26  ;;  %v478_v29 = vmax.f32 %v378_v25, %v446_v27 }
  0xa6   : > { %v502_v30 = vpack.c.bf16 %v470_v28, %v470_v28  ;;  %v510_v31 = vpack.c.bf16 %v478_v29, %v478_v29 }
  0xa8   : > { %535 = vst.msk [vmem:[%s866_s28] sm:$0xf] %vm534_vm2, %v502_v30  ;;  %v398_v32 = vpop.f32.mrf.mxu2  ;;  %v418_v33 = vpop.f32.mrf.mxu3 }
  0xa9   : > { %543 = vst.msk [vmem:[%s866_s28 + $0x20] sm:$0xf] %vm534_vm2, %v510_v31  ;;  %v454_v34 = vmul.f32 0.1, %v398_v32  ;;  %v462_v35 = vmul.f32 0.1, %v418_v33  ;;  %v360_v36 = vpop.f32.mrf.mxu0  ;;  %v380_v37 = vpop.f32.mrf.mxu1 }
  0xaa   : > { %v439_v38 = vmul.f32 0.1, %v360_v36  ;;  %v447_v39 = vmul.f32 0.1, %v380_v37 }
  0xab   : > { %v486_v40 = vmax.f32 %v398_v32, %v454_v34  ;;  %v494_v41 = vmax.f32 %v418_v33, %v462_v35 }
  0xac   : > { %v471_v42 = vmax.f32 %v360_v36, %v439_v38  ;;  %v479_v43 = vmax.f32 %v380_v37, %v447_v39 }
  0xad   : > { %v518_v44 = vpack.c.bf16 %v486_v40, %v486_v40  ;;  %v526_v45 = vpack.c.bf16 %v494_v41, %v494_v41 }
  0xae   : > { %v503_v46 = vpack.c.bf16 %v471_v42, %v471_v42  ;;  %v511_v47 = vpack.c.bf16 %v479_v43, %v479_v43 }
  0xaf   : > { %551 = vst.msk [vmem:[%s866_s28 + $0x40] sm:$0xf] %vm534_vm2, %v518_v44 }
  0xb0   : > { %559 = vst.msk [vmem:[%s866_s28 + $0x60] sm:$0xf] %vm534_vm2, %v526_v45  ;;  %v400_v48 = vpop.f32.mrf.mxu2  ;;  %v420_v49 = vpop.f32.mrf.mxu3 }
  0xb1   : > { %536 = vst.msk [vmem:[%s866_s28 + $0x4] sm:$0xf] %vm534_vm2, %v503_v46  ;;  %v455_v50 = vmul.f32 0.1, %v400_v48  ;;  %v463_v51 = vmul.f32 0.1, %v420_v49  ;;  %v363_v52 = vpop.f32.mrf.mxu0  ;;  %v383_v53 = vpop.f32.mrf.mxu1 }
  0xb2   : > { %544 = vst.msk [vmem:[%s866_s28 + $0x24] sm:$0xf] %vm534_vm2, %v511_v47  ;;  %v440_v54 = vmul.f32 0.1, %v363_v52  ;;  %v448_v55 = vmul.f32 0.1, %v383_v53 }
  0xb3   : > { %v487_v56 = vmax.f32 %v400_v48, %v455_v50  ;;  %v495_v57 = vmax.f32 %v420_v49, %v463_v51 }
  0xb4   : > { %v472_v58 = vmax.f32 %v363_v52, %v440_v54  ;;  %v480_v59 = vmax.f32 %v383_v53, %v448_v55 }
  0xb5   : > { %v519_v60 = vpack.c.bf16 %v487_v56, %v487_v56  ;;  %v527_v61 = vpack.c.bf16 %v495_v57, %v495_v57 }
  0xb6   : > { %v504_v62 = vpack.c.bf16 %v472_v58, %v472_v58  ;;  %v512_v63 = vpack.c.bf16 %v480_v59, %v480_v59 }
  0xb7   : > { %552 = vst.msk [vmem:[%s866_s28 + $0x44] sm:$0xf] %vm534_vm2, %v519_v60 }
  0xb8   : > { %560 = vst.msk [vmem:[%s866_s28 + $0x64] sm:$0xf] %vm534_vm2, %v527_v61  ;;  %v403_v0 = vpop.f32.mrf.mxu2  ;;  %v423_v1 = vpop.f32.mrf.mxu3 }
  0xb9   : > { %537 = vst.msk [vmem:[%s866_s28 + $0x8] sm:$0xf] %vm534_vm2, %v504_v62  ;;  %v456_v2 = vmul.f32 0.1, %v403_v0  ;;  %v464_v3 = vmul.f32 0.1, %v423_v1  ;;  %v365_v4 = vpop.f32.mrf.mxu0  ;;  %v385_v5 = vpop.f32.mrf.mxu1 }
  0xba   : > { %545 = vst.msk [vmem:[%s866_s28 + $0x28] sm:$0xf] %vm534_vm2, %v512_v63  ;;  %v441_v6 = vmul.f32 0.1, %v365_v4  ;;  %v449_v7 = vmul.f32 0.1, %v385_v5 }
  0xbb   : > { %v488_v8 = vmax.f32 %v403_v0, %v456_v2  ;;  %v496_v9 = vmax.f32 %v423_v1, %v464_v3 }
  0xbc   : > { %v473_v10 = vmax.f32 %v365_v4, %v441_v6  ;;  %v481_v11 = vmax.f32 %v385_v5, %v449_v7 }
  0xbd   : > { %v520_v12 = vpack.c.bf16 %v488_v8, %v488_v8  ;;  %v528_v13 = vpack.c.bf16 %v496_v9, %v496_v9 }
  0xbe   : > { %v505_v14 = vpack.c.bf16 %v473_v10, %v473_v10  ;;  %v513_v15 = vpack.c.bf16 %v481_v11, %v481_v11 }
  0xbf   : > { %553 = vst.msk [vmem:[%s866_s28 + $0x48] sm:$0xf] %vm534_vm2, %v520_v12 }
  0xc0   : > { %561 = vst.msk [vmem:[%s866_s28 + $0x68] sm:$0xf] %vm534_vm2, %v528_v13  ;;  %v405_v16 = vpop.f32.mrf.mxu2  ;;  %v425_v17 = vpop.f32.mrf.mxu3 }
  0xc1   : > { %538 = vst.msk [vmem:[%s866_s28 + $0xc] sm:$0xf] %vm534_vm2, %v505_v14  ;;  %v457_v18 = vmul.f32 0.1, %v405_v16  ;;  %v465_v19 = vmul.f32 0.1, %v425_v17  ;;  %v368_v20 = vpop.f32.mrf.mxu0  ;;  %v388_v21 = vpop.f32.mrf.mxu1 }
  0xc2   : > { %546 = vst.msk [vmem:[%s866_s28 + $0x2c] sm:$0xf] %vm534_vm2, %v513_v15  ;;  %v442_v22 = vmul.f32 0.1, %v368_v20  ;;  %v450_v23 = vmul.f32 0.1, %v388_v21 }
  0xc3   : > { %v489_v24 = vmax.f32 %v405_v16, %v457_v18  ;;  %v497_v25 = vmax.f32 %v425_v17, %v465_v19 }
  0xc4   : > { %v474_v26 = vmax.f32 %v368_v20, %v442_v22  ;;  %v482_v27 = vmax.f32 %v388_v21, %v450_v23 }
  0xc5   : > { %v521_v28 = vpack.c.bf16 %v489_v24, %v489_v24  ;;  %v529_v29 = vpack.c.bf16 %v497_v25, %v497_v25 }
  0xc6   : > { %v506_v30 = vpack.c.bf16 %v474_v26, %v474_v26  ;;  %v514_v31 = vpack.c.bf16 %v482_v27, %v482_v27 }
  0xc7   : > { %554 = vst.msk [vmem:[%s866_s28 + $0x4c] sm:$0xf] %vm534_vm2, %v521_v28 }
  0xc8   : > { %562 = vst.msk [vmem:[%s866_s28 + $0x6c] sm:$0xf] %vm534_vm2, %v529_v29  ;;  %v408_v32 = vpop.f32.mrf.mxu2  ;;  %v428_v33 = vpop.f32.mrf.mxu3 }
  0xc9   : > { %539 = vst.msk [vmem:[%s866_s28 + $0x10] sm:$0xf] %vm534_vm2, %v506_v30  ;;  %v458_v34 = vmul.f32 0.1, %v408_v32  ;;  %v466_v35 = vmul.f32 0.1, %v428_v33  ;;  %v370_v36 = vpop.f32.mrf.mxu0  ;;  %v390_v37 = vpop.f32.mrf.mxu1 }
  0xca   : > { %547 = vst.msk [vmem:[%s866_s28 + $0x30] sm:$0xf] %vm534_vm2, %v514_v31  ;;  %v443_v38 = vmul.f32 0.1, %v370_v36  ;;  %v451_v39 = vmul.f32 0.1, %v390_v37 }
  0xcb   : > { %v490_v40 = vmax.f32 %v408_v32, %v458_v34  ;;  %v498_v41 = vmax.f32 %v428_v33, %v466_v35 }
  0xcc   : > { %v475_v42 = vmax.f32 %v370_v36, %v443_v38  ;;  %v483_v43 = vmax.f32 %v390_v37, %v451_v39 }
  0xcd   : > { %v522_v44 = vpack.c.bf16 %v490_v40, %v490_v40  ;;  %v530_v45 = vpack.c.bf16 %v498_v41, %v498_v41 }
  0xce   : > { %v507_v46 = vpack.c.bf16 %v475_v42, %v475_v42  ;;  %v515_v47 = vpack.c.bf16 %v483_v43, %v483_v43 }
  0xcf   : > { %555 = vst.msk [vmem:[%s866_s28 + $0x50] sm:$0xf] %vm534_vm2, %v522_v44 }
  0xd0   : > { %563 = vst.msk [vmem:[%s866_s28 + $0x70] sm:$0xf] %vm534_vm2, %v530_v45  ;;  %v410_v48 = vpop.f32.mrf.mxu2  ;;  %v430_v49 = vpop.f32.mrf.mxu3 }
  0xd1   : > { %540 = vst.msk [vmem:[%s866_s28 + $0x14] sm:$0xf] %vm534_vm2, %v507_v46  ;;  %v459_v50 = vmul.f32 0.1, %v410_v48  ;;  %v467_v51 = vmul.f32 0.1, %v430_v49  ;;  %v373_v52 = vpop.f32.mrf.mxu0  ;;  %v393_v53 = vpop.f32.mrf.mxu1 }
  0xd2   : > { %548 = vst.msk [vmem:[%s866_s28 + $0x34] sm:$0xf] %vm534_vm2, %v515_v47  ;;  %v444_v54 = vmul.f32 0.1, %v373_v52  ;;  %v452_v55 = vmul.f32 0.1, %v393_v53 }
  0xd3   : > { %v491_v56 = vmax.f32 %v410_v48, %v459_v50  ;;  %v499_v57 = vmax.f32 %v430_v49, %v467_v51 }
  0xd4   : > { %v476_v58 = vmax.f32 %v373_v52, %v444_v54  ;;  %v484_v59 = vmax.f32 %v393_v53, %v452_v55 }
  0xd5   : > { %v523_v60 = vpack.c.bf16 %v491_v56, %v491_v56  ;;  %v531_v61 = vpack.c.bf16 %v499_v57, %v499_v57 }
  0xd6   : > { %v508_v62 = vpack.c.bf16 %v476_v58, %v476_v58  ;;  %v516_v63 = vpack.c.bf16 %v484_v59, %v484_v59 }
  0xd7   : > { %556 = vst.msk [vmem:[%s866_s28 + $0x54] sm:$0xf] %vm534_vm2, %v523_v60 }
  0xd8   : > { %564 = vst.msk [vmem:[%s866_s28 + $0x74] sm:$0xf] %vm534_vm2, %v531_v61  ;;  %v413_v0 = vpop.f32.mrf.mxu2  ;;  %v433_v1 = vpop.f32.mrf.mxu3 }
  0xd9   : > { %541 = vst.msk [vmem:[%s866_s28 + $0x18] sm:$0xf] %vm534_vm2, %v508_v62  ;;  %v460_v2 = vmul.f32 0.1, %v413_v0  ;;  %v468_v3 = vmul.f32 0.1, %v433_v1  ;;  %v375_v4 = vpop.f32.mrf.mxu0  ;;  %v395_v5 = vpop.f32.mrf.mxu1 }
  0xda   : > { %549 = vst.msk [vmem:[%s866_s28 + $0x38] sm:$0xf] %vm534_vm2, %v516_v63  ;;  %v445_v6 = vmul.f32 0.1, %v375_v4  ;;  %v453_v7 = vmul.f32 0.1, %v395_v5 }
  0xdb   : > { %v492_v8 = vmax.f32 %v413_v0, %v460_v2  ;;  %v500_v9 = vmax.f32 %v433_v1, %v468_v3 }
  0xdc   : > { %v477_v10 = vmax.f32 %v375_v4, %v445_v6  ;;  %v485_v11 = vmax.f32 %v395_v5, %v453_v7 }
  0xdd   : > { %v524_v12 = vpack.c.bf16 %v492_v8, %v492_v8  ;;  %v532_v13 = vpack.c.bf16 %v500_v9, %v500_v9 }
  0xde   : > { %v509_v14 = vpack.c.bf16 %v477_v10, %v477_v10  ;;  %v517_v15 = vpack.c.bf16 %v485_v11, %v485_v11 }
  0xdf   : > { %557 = vst.msk [vmem:[%s866_s28 + $0x58] sm:$0xf] %vm534_vm2, %v524_v12 }
  0xe0   : > { %565 = vst.msk [vmem:[%s866_s28 + $0x78] sm:$0xf] %vm534_vm2, %v532_v13  ;;  %v415_v16 = vpop.f32.mrf.mxu2  ;;  %v435_v17 = vpop.f32.mrf.mxu3 }
  0xe1   : > { %542 = vst.msk [vmem:[%s866_s28 + $0x1c] sm:$0xf] %vm534_vm2, %v509_v14  ;;  %v461_v18 = vmul.f32 0.1, %v415_v16  ;;  %v469_v19 = vmul.f32 0.1, %v435_v17 }
  0xe2   : > { %550 = vst.msk [vmem:[%s866_s28 + $0x3c] sm:$0xf] %vm534_vm2, %v517_v15 }
  0xe3   : > { %v493_v20 = vmax.f32 %v415_v16, %v461_v18  ;;  %v501_v21 = vmax.f32 %v435_v17, %v469_v19 }
  0xe5   : > { %v525_v22 = vpack.c.bf16 %v493_v20, %v493_v20  ;;  %v533_v23 = vpack.c.bf16 %v501_v21, %v501_v21 }
  0xe7   : > { %558 = vst.msk [vmem:[%s866_s28 + $0x5c] sm:$0xf] %vm534_vm2, %v525_v22 }
  0xe8   : > { %566 = vst.msk [vmem:[%s866_s28 + $0x7c] sm:$0xf] %vm534_vm2, %v533_v23 }
  0xe9 PF: > { %s12_s9 = sadd.s32 1, %s779_s9  }
  0xea   : > { %p9_p4 = scmp.ge.s32.totalorder %s12_s9, 4  }
  0xec   :  { %11 = sbr.rel (!%p9_p4) target bundleno = 1 (0x1), region = 58 }

// kernel: _lambda_.5
= control target key start
LH: loop header
LB: loop body
LE: loop exit
PB: predicated region body
PF: predicated region fallthrough
CT: control target
= control target key end

     0   :  { %s670_s0 = inlined_call_operand.vmem [shape: bf16[2,512], index: 0, kind: input, shape index: {}]   ;;  %s671_s1 = inlined_call_operand.vmem [shape: bf16[512,32], index: 1, kind: input, shape index: {}]   ;;  %s672_s2 = inlined_call_operand.vmem [shape: f32[1,32], index: 2, kind: input, shape index: {}]   ;;  %s673_s3 = inlined_call_operand.hbm [shape: f32[2,32], index: 3, kind: output, shape index: {}]  }
   0x1   :  { %v491_v0 = vld [vmem:[%s671_s1 + $0x38] sm:$0xff]  ;;  %v490_v4 = vld [vmem:[%s671_s1 + $0x30] sm:$0xff]  ;;  %v489_v8 = vld [vmem:[%s671_s1 + $0x28] sm:$0xff] }
   0x2   :  { %v499_v1 = vld [vmem:[%s671_s1 + $0x78] sm:$0xff]  ;;  %286 = vmatpush.bf16.msra.mxu0 %v491_v0  ;;  %v498_v5 = vld [vmem:[%s671_s1 + $0x70] sm:$0xff]  ;;  %v497_v9 = vld [vmem:[%s671_s1 + $0x68] sm:$0xff] }
   0x3   :  { %v507_v2 = vld [vmem:[%s671_s1 + $0xb8] sm:$0xff]  ;;  %299 = vmatpush.bf16.msra.mxu1 %v499_v1  ;;  %v506_v6 = vld [vmem:[%s671_s1 + $0xb0] sm:$0xff]  ;;  %v505_v10 = vld [vmem:[%s671_s1 + $0xa8] sm:$0xff] }
   0x4   :  { %v515_v3 = vld [vmem:[%s671_s1 + $0xf8] sm:$0xff]  ;;  %312 = vmatpush.bf16.msra.mxu2 %v507_v2  ;;  %v514_v7 = vld [vmem:[%s671_s1 + $0xf0] sm:$0xff]  ;;  %v513_v11 = vld [vmem:[%s671_s1 + $0xe8] sm:$0xff] }
   0x5   :  { %325 = vmatpush.bf16.msra.mxu3 %v515_v3  ;;  %v488_v12 = vld [vmem:[%s671_s1 + $0x20] sm:$0xff] }
   0x6   :  { %287 = vmatpush.bf16.msra.mxu0 %v490_v4  ;;  %v496_v13 = vld [vmem:[%s671_s1 + $0x60] sm:$0xff] }
   0x7   :  { %300 = vmatpush.bf16.msra.mxu1 %v498_v5  ;;  %v15_v14 = vld [vmem:[%s670_s0] sm:$0xf] }
   0x8   :  { %313 = vmatpush.bf16.msra.mxu2 %v506_v6  ;;  %v504_v15 = vld [vmem:[%s671_s1 + $0xa0] sm:$0xff]  ;;  %85 = vst [vmem:[#allocation1] ss:$9 sm:$0xff] %v15_v14 }
   0x9   :  { %326 = vmatpush.bf16.msra.mxu3 %v514_v7  ;;  %v512_v16 = vld [vmem:[%s671_s1 + $0xe0] sm:$0xff] }
   0xa   :  { %288 = vmatpush.bf16.msra.mxu0 %v489_v8 }
   0xb   :  { %301 = vmatpush.bf16.msra.mxu1 %v497_v9 }
   0xc   :  { %314 = vmatpush.bf16.msra.mxu2 %v505_v10 }
   0xd   :  { %327 = vmatpush.bf16.msra.mxu3 %v513_v11 }
   0xe   :  { %8 = vsyncpa [#allocation3], 0  ;;  %289 = vmatpush.bf16.msra.mxu0 %v488_v12  ;;  %v487_v17 = vld [vmem:[%s671_s1 + $0x18] sm:$0xff]  ;;  %v486_v21 = vld [vmem:[%s671_s1 + $0x10] sm:$0xff]  ;;  %s347_s27 = sshll.u32 %s673_s3, 4  ;;  %vm338_vm0 = vcmask 254976   ;;  %s348_s27 = int_to_ptr.hbm [resolvable:$true] %s347_s27 }
   0xf   :  { %302 = vmatpush.bf16.msra.mxu1 %v496_v13  ;;  %v495_v18 = vld [vmem:[%s671_s1 + $0x58] sm:$0xff]  ;;  %v494_v22 = vld [vmem:[%s671_s1 + $0x50] sm:$0xff]  ;;  %v485_v25 = vld [vmem:[%s671_s1 + $0x8] sm:$0xff] }
  0x10   :  { %315 = vmatpush.bf16.msra.mxu2 %v504_v15  ;;  %v503_v19 = vld [vmem:[%s671_s1 + $0x98] sm:$0xff]  ;;  %v502_v23 = vld [vmem:[%s671_s1 + $0x90] sm:$0xff]  ;;  %v493_v26 = vld [vmem:[%s671_s1 + $0x48] sm:$0xff] }
  0x11   :  { %328 = vmatpush.bf16.msra.mxu3 %v512_v16  ;;  %v511_v20 = vld [vmem:[%s671_s1 + $0xd8] sm:$0xff]  ;;  %v510_v24 = vld [vmem:[%s671_s1 + $0xd0] sm:$0xff]  ;;  %v501_v27 = vld [vmem:[%s671_s1 + $0x88] sm:$0xff] }
  0x12   :  { %290 = vmatpush.bf16.msra.mxu0 %v487_v17  ;;  %v509_v28 = vld [vmem:[%s671_s1 + $0xc8] sm:$0xff]  ;;  %v484_v29 = vld [vmem:[%s671_s1] sm:$0xff]  ;;  %v88_v35 = vld [vmem:[#allocation1 + $0x12] sm:$0xff] }
  0x13   :  { %303 = vmatpush.bf16.msra.mxu1 %v495_v18  ;;  %v492_v30 = vld [vmem:[%s671_s1 + $0x40] sm:$0xff]  ;;  %v87_v34 = vld [vmem:[#allocation1 + $0x9] sm:$0xff] }
  0x14   :  { %316 = vmatpush.bf16.msra.mxu2 %v503_v19  ;;  %v500_v31 = vld [vmem:[%s671_s1 + $0x80] sm:$0xff] }
  0x15   :  { %329 = vmatpush.bf16.msra.mxu3 %v511_v20  ;;  %v508_v32 = vld [vmem:[%s671_s1 + $0xc0] sm:$0xff]  ;;  %s544_s1 = smov [#allocation2]  }
  0x16   :  { %291 = vmatpush.bf16.msra.mxu0 %v486_v21  ;;  %v86_v33 = vld [vmem:[#allocation1] sm:$0xff]  ;;  %s345_s24 = sshll.u32 %s544_s1, 4  ;;  %s346_s24 = int_to_ptr.vmem [resolvable:$true] %s345_s24 }
  0x17   :  { %304 = vmatpush.bf16.msra.mxu1 %v494_v22  ;;  %v89_v36 = vld [vmem:[#allocation1 + $0x1b] sm:$0xff] }
  0x18   :  { %317 = vmatpush.bf16.msra.mxu2 %v502_v23  ;;  %v517_v37 = vld [vmem:[%s672_s2] ss:$0 sm:$0xff] }
  0x19   :  { %330 = vmatpush.bf16.msra.mxu3 %v510_v24 }
  0x1a   :  { %292 = vmatpush.bf16.msra.mxu0 %v485_v25 }
  0x1b   :  { %305 = vmatpush.bf16.msra.mxu1 %v493_v26 }
  0x1c   :  { %318 = vmatpush.bf16.msra.mxu2 %v501_v27 }
  0x1d   :  { %331 = vmatpush.bf16.msra.mxu3 %v509_v28 }
  0x1e   :  { %293 = vmatpush.bf16.msra.mxu0 %v484_v29 }
  0x1f   :  { %306 = vmatpush.bf16.msra.mxu1 %v492_v30 }
  0x20   :  { %319 = vmatpush.bf16.msra.mxu2 %v500_v31 }
  0x21   :  { %332 = vmatpush.bf16.msra.mxu3 %v508_v32  ;;  %294 = vmatmul.bf16.vlgmr.msra.gmra.mxu0 %v86_v33 }
  0x22   :  { %307 = vmatmul.bf16.vlgmr.msra.gmra.mxu1 %v87_v34 }
  0x23   :  { %320 = vmatmul.bf16.vlgmr.msra.gmra.mxu2 %v88_v35 }
  0x24   :  { %333 = vmatmul.bf16.vlgmr.msra.gmra.mxu3 %v89_v36 }
  0x9e   :  { %v295_v38 = vpop.f32.mrf.mxu0 }
  0x9f   :  { %v308_v39 = vpop.f32.mrf.mxu1  ;;  %v296_v40 = vadd.f32 %v517_v37, %v295_v38 }
  0xa1   :  { %v309_v41 = vadd.f32 %v308_v39, %v296_v40 }
  0xa6   :  { %v321_v42 = vpop.f32.mrf.mxu2  ;;  %v297_v45 = vpop.f32.mrf.mxu0 }
  0xa7   :  { %v334_v43 = vpop.f32.mrf.mxu3  ;;  %v322_v44 = vadd.f32 %v321_v42, %v309_v41  ;;  %v310_v46 = vpop.f32.mrf.mxu1 }
  0xa9   :  { %v335_v47 = vadd.f32 %v334_v43, %v322_v44 }
  0xab   :  { %339 = vst.msk [vmem:[#allocation2] sm:$0x3] %vm338_vm0, %v335_v47 }
  0xac   :  { %350 = dma.vmem_to_hbm [thread:$0]  %s346_s24, 32, %s348_s27, [#allocation3]  }
  0xae   :  { %v323_v48 = vpop.f32.mrf.mxu2 }
  0xaf   :  { %v336_v49 = vpop.f32.mrf.mxu3 }
  0xb0   :  { %542 = dma.done.wait [#allocation3], 32  }
  0xb1   :  { %543 = vsyncadd [#allocation3], 4294967264 }
  0xb2   :  { %355 = vsyncpa [#allocation3], 1 }

// kernel: _lambda_.4
= control target key start
LH: loop header
LB: loop body
LE: loop exit
PB: predicated region body
PF: predicated region fallthrough
CT: control target
= control target key end

     0   :  { %s783_s15 = smov 0   ;;  %s1034_s0 = inlined_call_operand.vmem [shape: bf16[128,128], index: 0, kind: input, shape index: {}]   ;;  %s1035_s1 = inlined_call_operand.vmem [shape: bf16[128,8], index: 1, kind: input, shape index: {}]   ;;  %s1036_s2 = inlined_call_operand.vmem [shape: f32[1,8], index: 2, kind: input, shape index: {}]   ;;  %s1037_s3 = inlined_call_operand.vmem [shape: f32[1,8], index: 3, kind: input, shape index: {}]   ;;  %s1038_s4 = inlined_call_operand.vmem [shape: bf16[128,8], index: 4, kind: output, shape index: {}]  }
   0x1 LB: > { %s789_s16 = sadd.s32 4294967295, %s756_s15   ;;  %p648_p0 = scmp.ge.s32.totalorder %s756_s15, 1  ;;  %s756_s15 = sphi %s783_s15, %s14_s15  }
   0x2   : > { %p158_p1 = scmp.lt.s32.totalorder %s756_s15, 3 }
   0x4   : > { %p159_p2 = pnand %p648_p0, %p158_p1 }
   0x5   : > { %s649_s25 = sshll.u32 (!%p159_p2), %s789_s16, 3  ;;  %s699_s12 = sshll.u32 (!%p159_p2), %s789_s16, 6 }
   0x6   : > { %162 = sbr.rel (%p159_p2) target bundleno = 337 (0x151), region = 36  ;;  %p180_p3 = scmp.lt.s32.totalorder (!%p159_p2), %s649_s25, 15 }
   0x7   : > { %s311_s13 = scalar_lea.vmem (!%p159_p2), [#allocation2], %s699_s12  ;;  %p700_p4 = scmp.ne.s32.totalorder (!%p159_p2), %s789_s16, 1 }
   0xb   : > { %v714_v0 = vld [vmem:[%s1035_s1 + $0x38] sm:$0xff]  ;;  %v713_v1 = vld [vmem:[%s1035_s1 + $0x30] sm:$0xff]  ;;  %v712_v2 = vld [vmem:[%s1035_s1 + $0x28] sm:$0xff]  ;;  %s1040_s25 = smov (!%p180_p3, %s649_s25), 15  ;;  %vm312_vm0 = vcmask 64512  }
   0xc   : > { %281 = vmatpush.bf16.msra.mxu0 %v714_v0  ;;  %715 = vmatpush.bf16.msra.mxu1 %v714_v0  ;;  %v711_v3 = vld [vmem:[%s1035_s1 + $0x20] sm:$0xff]  ;;  %v710_v4 = vld [vmem:[%s1035_s1 + $0x18] sm:$0xff]  ;;  %v709_v5 = vld [vmem:[%s1035_s1 + $0x10] sm:$0xff]  ;;  %s650_s6 = sshll.u32 %s1040_s25, 2 }
   0xd   : > { %716 = vmatpush.bf16.msra.mxu2 %v714_v0  ;;  %717 = vmatpush.bf16.msra.mxu3 %v714_v0  ;;  %v708_v6 = vld [vmem:[%s1035_s1 + $0x8] sm:$0xff]  ;;  %v707_v7 = vld [vmem:[%s1035_s1] sm:$0xff]  ;;  %s183_s11 = scalar_lea.vmem %s1034_s0, %s650_s6 }
   0xe   : > { %v703_v8 = vld [vmem:[%s183_s11] sm:$0xff]  ;;  %v704_v9 = vld [vmem:[%s183_s11 + $0x8] sm:$0xff]  ;;  %v705_v10 = vld [vmem:[%s183_s11 + $0x10] sm:$0xff] }
   0xf   : > { %v706_v11 = vld [vmem:[%s183_s11 + $0x18] sm:$0xff] }
  0x10   : > { %282 = vmatpush.bf16.msra.mxu0 %v713_v1  ;;  %718 = vmatpush.bf16.msra.mxu1 %v713_v1 }
  0x11   : > { %719 = vmatpush.bf16.msra.mxu2 %v713_v1  ;;  %720 = vmatpush.bf16.msra.mxu3 %v713_v1 }
  0x14   : > { %283 = vmatpush.bf16.msra.mxu0 %v712_v2  ;;  %721 = vmatpush.bf16.msra.mxu1 %v712_v2 }
  0x15   : > { %722 = vmatpush.bf16.msra.mxu2 %v712_v2  ;;  %723 = vmatpush.bf16.msra.mxu3 %v712_v2 }
  0x18   : > { %284 = vmatpush.bf16.msra.mxu0 %v711_v3  ;;  %724 = vmatpush.bf16.msra.mxu1 %v711_v3 }
  0x19   : > { %725 = vmatpush.bf16.msra.mxu2 %v711_v3  ;;  %726 = vmatpush.bf16.msra.mxu3 %v711_v3 }
  0x1c   : > { %285 = vmatpush.bf16.msra.mxu0 %v710_v4  ;;  %727 = vmatpush.bf16.msra.mxu1 %v710_v4 }
  0x1d   : > { %728 = vmatpush.bf16.msra.mxu2 %v710_v4  ;;  %729 = vmatpush.bf16.msra.mxu3 %v710_v4 }
  0x20   : > { %286 = vmatpush.bf16.msra.mxu0 %v709_v5  ;;  %730 = vmatpush.bf16.msra.mxu1 %v709_v5 }
  0x21   : > { %731 = vmatpush.bf16.msra.mxu2 %v709_v5  ;;  %732 = vmatpush.bf16.msra.mxu3 %v709_v5 }
  0x24   : > { %287 = vmatpush.bf16.msra.mxu0 %v708_v6  ;;  %733 = vmatpush.bf16.msra.mxu1 %v708_v6 }
  0x25   : > { %734 = vmatpush.bf16.msra.mxu2 %v708_v6  ;;  %735 = vmatpush.bf16.msra.mxu3 %v708_v6 }
  0x28   : > { %288 = vmatpush.bf16.msra.mxu0 %v707_v7  ;;  %736 = vmatpush.bf16.msra.mxu1 %v707_v7 }
  0x29   : > { %737 = vmatpush.bf16.msra.mxu2 %v707_v7  ;;  %738 = vmatpush.bf16.msra.mxu3 %v707_v7 }
  0x2b   : > { %289 = vmatmul.bf16.vlgmr.msra.gmra.mxu0 %v703_v8  ;;  %294 = vmatmul.bf16.vlgmr.msra.gmra.mxu1 %v704_v9 }
  0x2c   : > { %299 = vmatmul.bf16.vlgmr.msra.gmra.mxu2 %v705_v10  ;;  %304 = vmatmul.bf16.vlgmr.msra.gmra.mxu3 %v706_v11 }
  0xa8   : > { %v290_v12 = vpop.f32.mrf.mxu0  ;;  %v295_v13 = vpop.f32.mrf.mxu1 }
  0xa9   : > { %313 = vst.msk [vmem:[%s311_s13] sm:$0xff] %vm312_vm0, %v290_v12 }
  0xaa   : > { %315 = vst.msk [vmem:[%s311_s13 + $0x10] sm:$0xff] %vm312_vm0, %v295_v13 }
  0xaf   : > { %v300_v14 = vpop.f32.mrf.mxu2  ;;  %v305_v15 = vpop.f32.mrf.mxu3 }
  0xb0   : > { %317 = vst.msk [vmem:[%s311_s13 + $0x20] sm:$0xff] %vm312_vm0, %v300_v14  ;;  %v292_v16 = vpop.f32.mrf.mxu0  ;;  %v297_v17 = vpop.f32.mrf.mxu1 }
  0xb1   : > { %319 = vst.msk [vmem:[%s311_s13 + $0x30] sm:$0xff] %vm312_vm0, %v305_v15 }
  0xb2   : > { %314 = vst.msk [vmem:[%s311_s13 + $0x8] sm:$0xff] %vm312_vm0, %v292_v16 }
  0xb3   : > { %316 = vst.msk [vmem:[%s311_s13 + $0x18] sm:$0xff] %vm312_vm0, %v297_v17 }
  0xb5   : > { %324 = sbr.rel (%p700_p4) target bundleno = 337 (0x151), region = 40 }
  0xb7   : > { %v302_v18 = vpop.f32.mrf.mxu2  ;;  %v307_v19 = vpop.f32.mrf.mxu3 }
  0xb8   : > { %318 = vst.msk [vmem:[%s311_s13 + $0x28] sm:$0xff] %vm312_vm0, %v302_v18 }
  0xb9   : > { %320 = vst.msk [vmem:[%s311_s13 + $0x38] sm:$0xff] %vm312_vm0, %v307_v19 }
  0xba   : > { %vm598_vm4 = vcmask 60416  }
  0xc0   : > { %v325_v20 = vld [vmem:[#allocation2] sm:$0xff]  ;;  %v326_v21 = vld [vmem:[#allocation2 + $0x8] sm:$0xff]  ;;  %v327_v22 = vld [vmem:[#allocation2 + $0x10] sm:$0xff] }
  0xc1   : > { %v328_v23 = vld [vmem:[#allocation2 + $0x18] sm:$0xff]  ;;  %v341_v24 = vsel %vm312_vm0, %v325_v20, 0.0  ;;  %v342_v25 = vsel %vm312_vm0, %v326_v21, 0.0  ;;  %v344_v26 = vsel %vm312_vm0, %v327_v22, 0.0  ;;  %v329_v27 = vld [vmem:[#allocation2 + $0x20] sm:$0xff]  ;;  %v330_v30 = vld [vmem:[#allocation2 + $0x28] sm:$0xff] }
  0xc2   : > { %v343_v28 = vadd.f32 %v342_v25, %v341_v24  ;;  %v346_v29 = vsel %vm312_vm0, %v328_v23, 0.0  ;;  %v348_v32 = vsel %vm312_vm0, %v329_v27, 0.0  ;;  %v331_v33 = vld [vmem:[#allocation2 + $0x30] sm:$0xff]  ;;  %v350_v35 = vsel %vm312_vm0, %v330_v30, 0.0  ;;  %v332_v36 = vld [vmem:[#allocation2 + $0x38] sm:$0xff]  ;;  %v333_v39 = vld [vmem:[#allocation2 + $0x40] sm:$0xff] }
  0xc3   : > { %v352_v38 = vsel %vm312_vm0, %v331_v33, 0.0  ;;  %v354_v41 = vsel %vm312_vm0, %v332_v36, 0.0  ;;  %v334_v42 = vld [vmem:[#allocation2 + $0x48] sm:$0xff]  ;;  %v356_v44 = vsel %vm312_vm0, %v333_v39, 0.0  ;;  %v335_v45 = vld [vmem:[#allocation2 + $0x50] sm:$0xff]  ;;  %v336_v48 = vld [vmem:[#allocation2 + $0x58] sm:$0xff] }
  0xc4   : > { %v345_v31 = vadd.f32 %v344_v26, %v343_v28  ;;  %v358_v47 = vsel %vm312_vm0, %v334_v42, 0.0  ;;  %v360_v50 = vsel %vm312_vm0, %v335_v45, 0.0  ;;  %v337_v51 = vld [vmem:[#allocation2 + $0x60] sm:$0xff]  ;;  %v362_v53 = vsel %vm312_vm0, %v336_v48, 0.0  ;;  %v338_v54 = vld [vmem:[#allocation2 + $0x68] sm:$0xff]  ;;  %v339_v57 = vld [vmem:[#allocation2 + $0x70] sm:$0xff] }
  0xc5   : > { %v364_v56 = vsel %vm312_vm0, %v337_v51, 0.0  ;;  %v366_v59 = vsel %vm312_vm0, %v338_v54, 0.0  ;;  %v340_v60 = vld [vmem:[#allocation2 + $0x78] sm:$0xff]  ;;  %v368_v62 = vsel %vm312_vm0, %v339_v57, 0.0 }
  0xc6   : > { %v347_v34 = vadd.f32 %v346_v29, %v345_v31  ;;  %v370_v0 = vsel %vm312_vm0, %v340_v60, 0.0 }
  0xc8   : > { %v349_v37 = vadd.f32 %v348_v32, %v347_v34 }
  0xca   : > { %v351_v40 = vadd.f32 %v350_v35, %v349_v37 }
  0xcc   : > { %v353_v43 = vadd.f32 %v352_v38, %v351_v40 }
  0xce   : > { %v355_v46 = vadd.f32 %v354_v41, %v353_v43 }
  0xd0   : > { %v357_v49 = vadd.f32 %v356_v44, %v355_v46 }
  0xd2   : > { %v359_v52 = vadd.f32 %v358_v47, %v357_v49 }
  0xd4   : > { %v361_v55 = vadd.f32 %v360_v50, %v359_v52 }
  0xd6   : > { %v363_v58 = vadd.f32 %v362_v53, %v361_v55 }
  0xd8   : > { %v365_v61 = vadd.f32 %v364_v56, %v363_v58 }
  0xda   : > { %v367_v63 = vadd.f32 %v366_v59, %v365_v61 }
  0xdc   : > { %v369_v1 = vadd.f32 %v368_v62, %v367_v63 }
  0xde   : > { %v371_v2 = vadd.f32 %v370_v0, %v369_v1 }
  0xe0   : > { %v372_v3 = vrot.slane %v371_v2, 4 }
  0xe2   : > { %v373_v4 = vadd.f32 %v372_v3, %v371_v2 }
  0xe4   : > { %v374_v5 = vrot.slane %v373_v4, 2 }
  0xe6   : > { %v375_v6 = vadd.f32 %v374_v5, %v373_v4 }
  0xe8   : > { %v376_v7 = vrot.slane %v375_v6, 1 }
  0xea   : > { %v377_v8 = vadd.f32 %v376_v7, %v375_v6 }
  0xec   : > { %v378_v9 = vmul.f32 0.0078125, %v377_v8 }
  0xee   : > { %v847_v10 = vsub.f32 %v325_v20, %v378_v9  ;;  %v849_v11 = vsub.f32 %v326_v21, %v378_v9  ;;  %v851_v12 = vsub.f32 %v327_v22, %v378_v9  ;;  %v853_v13 = vsub.f32 %v328_v23, %v378_v9 }
  0xef   : > { %v855_v14 = vsub.f32 %v329_v27, %v378_v9  ;;  %v863_v18 = vsub.f32 %v330_v30, %v378_v9  ;;  %v867_v20 = vsub.f32 %v331_v33, %v378_v9  ;;  %v874_v26 = vsub.f32 %v332_v36, %v378_v9 }
  0xf0   : > { %v444_v15 = vmul.f32 %v847_v10, %v847_v10  ;;  %v445_v16 = vmul.f32 %v849_v11, %v849_v11  ;;  %v446_v17 = vmul.f32 %v851_v12, %v851_v12  ;;  %v447_v19 = vmul.f32 %v853_v13, %v853_v13 }
  0xf1   : > { %v448_v21 = vmul.f32 %v855_v14, %v855_v14  ;;  %v449_v27 = vmul.f32 %v863_v18, %v863_v18  ;;  %v879_v30 = vsub.f32 %v333_v39, %v378_v9  ;;  %v450_v31 = vmul.f32 %v867_v20, %v867_v20 }
  0xf2   : > { %v460_v22 = vsel %vm312_vm0, %v444_v15, 0.0  ;;  %v461_v23 = vsel %vm312_vm0, %v445_v16, 0.0  ;;  %v463_v24 = vsel %vm312_vm0, %v446_v17, 0.0  ;;  %v465_v28 = vsel %vm312_vm0, %v447_v19, 0.0 }
  0xf3   : > { %v462_v25 = vadd.f32 %v461_v23, %v460_v22  ;;  %v467_v32 = vsel %vm312_vm0, %v448_v21, 0.0  ;;  %v884_v34 = vsub.f32 %v334_v42, %v378_v9  ;;  %v451_v35 = vmul.f32 %v874_v26, %v874_v26 }
  0xf4   : > { %v469_v36 = vsel %vm312_vm0, %v449_v27, 0.0  ;;  %v889_v38 = vsub.f32 %v335_v45, %v378_v9  ;;  %v452_v39 = vmul.f32 %v879_v30, %v879_v30  ;;  %v471_v40 = vsel %vm312_vm0, %v450_v31, 0.0  ;;  %v498_v31 = vld [vmem:[%s1036_s2] sm:$0x1] }
  0xf5   : > { %v464_v29 = vadd.f32 %v463_v24, %v462_v25  ;;  %v894_v43 = vsub.f32 %v336_v48, %v378_v9  ;;  %v453_v42 = vmul.f32 %v884_v34, %v884_v34  ;;  %v473_v44 = vsel %vm312_vm0, %v451_v35, 0.0 }
  0xf6   : > { %v899_v47 = vsub.f32 %v337_v51, %v378_v9  ;;  %v454_v45 = vmul.f32 %v889_v38, %v889_v38  ;;  %v475_v49 = vsel %vm312_vm0, %v452_v39, 0.0  ;;  %v904_v52 = vsub.f32 %v338_v54, %v378_v9 }
  0xf7   : > { %v466_v33 = vadd.f32 %v465_v28, %v464_v29  ;;  %v455_v48 = vmul.f32 %v894_v43, %v894_v43  ;;  %v477_v53 = vsel %vm312_vm0, %v453_v42, 0.0  ;;  %v909_v56 = vsub.f32 %v339_v57, %v378_v9 }
  0xf8   : > { %v456_v51 = vmul.f32 %v899_v47, %v899_v47  ;;  %v479_v58 = vsel %vm312_vm0, %v454_v45, 0.0  ;;  %v914_v61 = vsub.f32 %v340_v60, %v378_v9  ;;  %v457_v54 = vmul.f32 %v904_v52, %v904_v52 }
  0xf9   : > { %v468_v37 = vadd.f32 %v467_v32, %v466_v33  ;;  %v481_v62 = vsel %vm312_vm0, %v455_v48, 0.0  ;;  %v458_v0 = vmul.f32 %v909_v56, %v909_v56 }
  0xfa   : > { %v483_v57 = vsel %vm312_vm0, %v456_v51, 0.0  ;;  %v459_v2 = vmul.f32 %v914_v61, %v914_v61  ;;  %v485_v3 = vsel %vm312_vm0, %v457_v54, 0.0 }
  0xfb   : > { %v470_v41 = vadd.f32 %v469_v36, %v468_v37  ;;  %v487_v60 = vsel %vm312_vm0, %v458_v0, 0.0  ;;  %v933_v37 = vld [vmem:[%s1037_s3] ss:$0 sm:$0xff] }
  0xfc   : > { %v489_v6 = vsel %vm312_vm0, %v459_v2, 0.0 }
  0xfd   : > { %v472_v46 = vadd.f32 %v471_v40, %v470_v41 }
  0xff   : > { %v474_v50 = vadd.f32 %v473_v44, %v472_v46 }
 0x101   : > { %v476_v55 = vadd.f32 %v475_v49, %v474_v50 }
 0x103   : > { %v478_v59 = vadd.f32 %v477_v53, %v476_v55 }
 0x105   : > { %v480_v63 = vadd.f32 %v479_v58, %v478_v59 }
 0x107   : > { %v482_v1 = vadd.f32 %v481_v62, %v480_v63 }
 0x109   : > { %v484_v4 = vadd.f32 %v483_v57, %v482_v1 }
 0x10b   : > { %v486_v5 = vadd.f32 %v485_v3, %v484_v4 }
 0x10d   : > { %v488_v7 = vadd.f32 %v487_v60, %v486_v5 }
 0x10f   : > { %v490_v8 = vadd.f32 %v489_v6, %v488_v7 }
 0x111   : > { %v491_v9 = vrot.slane %v490_v8, 4 }
 0x113   : > { %v492_v15 = vadd.f32 %v491_v9, %v490_v8 }
 0x115   : > { %v493_v16 = vrot.slane %v492_v15, 2 }
 0x117   : > { %v494_v17 = vadd.f32 %v493_v16, %v492_v15 }
 0x119   : > { %v495_v19 = vrot.slane %v494_v17, 1 }
 0x11b   : > { %v496_v21 = vadd.f32 %v495_v19, %v494_v17 }
 0x11d   : > { %v497_v22 = vmul.f32 0.0078125, %v496_v21 }
 0x11f   : > { %v499_v23 = vadd.f32 1e-05, %v497_v22 }
 0x121   : > { %748 = vrsqrt.f32 %v499_v23  ;;  %vm506_vm1 = vweird.f32 %v499_v23 }
 0x127   : > { %v749_v24 = vpop.eup %748 }
 0x128   : > { %v501_v25 = vmul.f32 %v749_v24, %v499_v23  ;;  %vm507_vm2 = vweird.f32 %v749_v24 }
 0x129   : > { %vm508_vm3 = vmor %vm506_vm1, %vm507_vm2 }
 0x12a   : > { %v502_v27 = vmul.f32 %v749_v24, %v501_v25 }
 0x12c   : > { %v503_v28 = vmul.f32 0.5, %v502_v27 }
 0x12e   : > { %v504_v29 = vsub.f32 1.5, %v503_v28 }
 0x130   : > { %v505_v32 = vmul.f32 %v749_v24, %v504_v29 }
 0x132   : > { %v509_v33 = vsel %vm508_vm3, %v749_v24, %v505_v32 }
 0x133   : > { %v510_v35 = vmul.f32 %v509_v33, %v498_v31 }
 0x135   : > { %v512_v36 = vperm.slane %v510_v35, 0 }
 0x137   : > { %v514_v39 = vmul.f32 %v512_v36, %v847_v10  ;;  %v515_v40 = vmul.f32 %v512_v36, %v849_v11  ;;  %v516_v41 = vmul.f32 %v512_v36, %v851_v12  ;;  %v517_v42 = vmul.f32 %v512_v36, %v853_v13 }
 0x138   : > { %v518_v44 = vmul.f32 %v512_v36, %v855_v14  ;;  %v519_v46 = vmul.f32 %v512_v36, %v863_v18  ;;  %v520_v45 = vmul.f32 %v512_v36, %v867_v20  ;;  %v521_v49 = vmul.f32 %v512_v36, %v874_v26 }
 0x139   : > { %v534_v50 = vadd.f32 %v933_v37, %v514_v39  ;;  %v535_v48 = vadd.f32 %v933_v37, %v515_v40  ;;  %v536_v10 = vadd.f32 %v933_v37, %v516_v41  ;;  %v537_v11 = vadd.f32 %v933_v37, %v517_v42 }
 0x13a   : > { %v538_v12 = vadd.f32 %v933_v37, %v518_v44  ;;  %v539_v13 = vadd.f32 %v933_v37, %v519_v46  ;;  %v540_v14 = vadd.f32 %v933_v37, %v520_v45  ;;  %v541_v18 = vadd.f32 %v933_v37, %v521_v49 }
 0x13b   : > { %v550_v53 = vmul.f32 0.1, %v534_v50  ;;  %v551_v20 = vmul.f32 0.1, %v535_v48  ;;  %v552_v55 = vmul.f32 0.1, %v536_v10  ;;  %v522_v26 = vmul.f32 %v512_v36, %v879_v30 }
 0x13c   : > { %v553_v51 = vmul.f32 0.1, %v537_v11  ;;  %v554_v58 = vmul.f32 0.1, %v538_v12  ;;  %v555_v59 = vmul.f32 0.1, %v539_v13  ;;  %v523_v54 = vmul.f32 %v512_v36, %v884_v34 }
 0x13d   : > { %v566_v62 = vmax.f32 %v534_v50, %v550_v53  ;;  %v567_v63 = vmax.f32 %v535_v48, %v551_v20  ;;  %v568_v0 = vmax.f32 %v536_v10, %v552_v55  ;;  %v556_v57 = vmul.f32 0.1, %v540_v14 }
 0x13e   : > { %v569_v1 = vmax.f32 %v537_v11, %v553_v51  ;;  %v570_v2 = vmax.f32 %v538_v12, %v554_v58  ;;  %v571_v3 = vmax.f32 %v539_v13, %v555_v59  ;;  %v557_v4 = vmul.f32 0.1, %v541_v18 }
 0x13f   : > { %v582_v60 = vpack.c.bf16 %v566_v62, %v566_v62  ;;  %v583_v5 = vpack.c.bf16 %v567_v63, %v567_v63  ;;  %v584_v6 = vpack.c.bf16 %v568_v0, %v568_v0  ;;  %v572_v7 = vmax.f32 %v540_v14, %v556_v57 }
 0x140   : > { %v585_v8 = vpack.c.bf16 %v569_v1, %v569_v1  ;;  %v586_v9 = vpack.c.bf16 %v570_v2, %v570_v2  ;;  %v587_v30 = vpack.c.bf16 %v571_v3, %v571_v3  ;;  %v573_v15 = vmax.f32 %v541_v18, %v557_v4 }
 0x141   : > { %599 = vst.msk [vmem:[%s1038_s4] sm:$0xf] %vm598_vm4, %v582_v60  ;;  %v588_v34 = vpack.c.bf16 %v572_v7, %v572_v7  ;;  %v542_v16 = vadd.f32 %v933_v37, %v522_v26  ;;  %v543_v17 = vadd.f32 %v933_v37, %v523_v54  ;;  %v524_v19 = vmul.f32 %v512_v36, %v889_v38 }
 0x142   : > { %600 = vst.msk [vmem:[%s1038_s4 + $0x4] sm:$0xf] %vm598_vm4, %v583_v5  ;;  %v589_v21 = vpack.c.bf16 %v573_v15, %v573_v15  ;;  %v525_v22 = vmul.f32 %v512_v36, %v894_v43  ;;  %v526_v23 = vmul.f32 %v512_v36, %v899_v47  ;;  %v527_v24 = vmul.f32 %v512_v36, %v904_v52 }
 0x143   : > { %601 = vst.msk [vmem:[%s1038_s4 + $0x8] sm:$0xf] %vm598_vm4, %v584_v6  ;;  %v558_v25 = vmul.f32 0.1, %v542_v16  ;;  %v559_v27 = vmul.f32 0.1, %v543_v17  ;;  %v544_v38 = vadd.f32 %v933_v37, %v524_v19  ;;  %v528_v28 = vmul.f32 %v512_v36, %v909_v56 }
 0x144   : > { %602 = vst.msk [vmem:[%s1038_s4 + $0xc] sm:$0xf] %vm598_vm4, %v585_v8  ;;  %v545_v43 = vadd.f32 %v933_v37, %v525_v22  ;;  %v546_v47 = vadd.f32 %v933_v37, %v526_v23  ;;  %v547_v52 = vadd.f32 %v933_v37, %v527_v24  ;;  %v529_v29 = vmul.f32 %v512_v36, %v914_v61 }
 0x145   : > { %603 = vst.msk [vmem:[%s1038_s4 + $0x10] sm:$0xf] %vm598_vm4, %v586_v9  ;;  %v574_v31 = vmax.f32 %v542_v16, %v558_v25  ;;  %v575_v56 = vmax.f32 %v543_v17, %v559_v27  ;;  %v560_v32 = vmul.f32 0.1, %v544_v38  ;;  %v548_v33 = vadd.f32 %v933_v37, %v528_v28 }
 0x146   : > { %604 = vst.msk [vmem:[%s1038_s4 + $0x14] sm:$0xf] %vm598_vm4, %v587_v30  ;;  %v561_v35 = vmul.f32 0.1, %v545_v43  ;;  %v562_v39 = vmul.f32 0.1, %v546_v47  ;;  %v549_v40 = vadd.f32 %v933_v37, %v529_v29 }
 0x147   : > { %605 = vst.msk [vmem:[%s1038_s4 + $0x18] sm:$0xf] %vm598_vm4, %v588_v34  ;;  %v590_v61 = vpack.c.bf16 %v574_v31, %v574_v31  ;;  %v591_v36 = vpack.c.bf16 %v575_v56, %v575_v56  ;;  %v576_v41 = vmax.f32 %v544_v38, %v560_v32  ;;  %v563_v42 = vmul.f32 0.1, %v547_v52 }
 0x148   : > { %606 = vst.msk [vmem:[%s1038_s4 + $0x1c] sm:$0xf] %vm598_vm4, %v589_v21  ;;  %v577_v44 = vmax.f32 %v545_v43, %v561_v35  ;;  %v578_v46 = vmax.f32 %v546_v47, %v562_v39  ;;  %v564_v45 = vmul.f32 0.1, %v548_v33  ;;  %v565_v49 = vmul.f32 0.1, %v549_v40 }
 0x149   : > { %607 = vst.msk [vmem:[%s1038_s4 + $0x20] sm:$0xf] %vm598_vm4, %v590_v61  ;;  %v592_v37 = vpack.c.bf16 %v576_v41, %v576_v41  ;;  %v579_v50 = vmax.f32 %v547_v52, %v563_v42 }
 0x14a   : > { %608 = vst.msk [vmem:[%s1038_s4 + $0x24] sm:$0xf] %vm598_vm4, %v591_v36  ;;  %v593_v48 = vpack.c.bf16 %v577_v44, %v577_v44  ;;  %v594_v10 = vpack.c.bf16 %v578_v46, %v578_v46  ;;  %v580_v11 = vmax.f32 %v548_v33, %v564_v45  ;;  %v581_v12 = vmax.f32 %v549_v40, %v565_v49 }
 0x14b   : > { %609 = vst.msk [vmem:[%s1038_s4 + $0x28] sm:$0xf] %vm598_vm4, %v592_v37  ;;  %v595_v13 = vpack.c.bf16 %v579_v50, %v579_v50 }
 0x14c   : > { %610 = vst.msk [vmem:[%s1038_s4 + $0x2c] sm:$0xf] %vm598_vm4, %v593_v48  ;;  %v596_v14 = vpack.c.bf16 %v580_v11, %v580_v11  ;;  %v597_v18 = vpack.c.bf16 %v581_v12, %v581_v12 }
 0x14d   : > { %611 = vst.msk [vmem:[%s1038_s4 + $0x30] sm:$0xf] %vm598_vm4, %v594_v10 }
 0x14e   : > { %612 = vst.msk [vmem:[%s1038_s4 + $0x34] sm:$0xf] %vm598_vm4, %v595_v13 }
 0x14f   : > { %613 = vst.msk [vmem:[%s1038_s4 + $0x38] sm:$0xf] %vm598_vm4, %v596_v14 }
 0x150   : > { %614 = vst.msk [vmem:[%s1038_s4 + $0x3c] sm:$0xf] %vm598_vm4, %v597_v18 }
 0x151 PF: > { %s14_s15 = sadd.s32 1, %s756_s15  }
 0x152   : > { %p11_p5 = scmp.ge.s32.totalorder %s14_s15, 4  }
 0x154   :  { %13 = sbr.rel (!%p11_p5) target bundleno = 1 (0x1), region = 67 }

</bundles_post_ra>
